<compile_context>
chip_gen: v6e
topology: v6e:2x2x1
jax: 0.10.0
libtpu: 0.0.40
codegen_flags: <defaults>
</compile_context>

<pallas_src>
import functools

import jax
import jax.numpy as jnp
import numpy as np
from jax.experimental import pallas as pl
from jax.experimental.pallas import tpu as pltpu


def _downsample_kernel(x_ref, w_ref, b_ref, o_ref):
    # x_ref: (NB, H, Wo, 2C)   column pairs on the lane axis
    # w_ref: (16*C, Cout)      folded conv taps, row index = kh*4C + kw*C + ci
    # b_ref: (1, Cout)
    # o_ref: (NB, Ho*Wo, Cout)
    y = x_ref[...]
    nb, h, wo, c2 = y.shape
    c = c2 // 2
    ho = h // 2

    # Circular neighbours of each column pair == the circular padding along W.
    left = jnp.roll(y, 1, axis=2)      # left[..., j, :]  = y[..., j-1, :]
    right = jnp.roll(y, -1, axis=2)    # right[..., j, :] = y[..., j+1, :]

    # z[..., j, kw*C + ci] = padded input column (2j + kw), kw = 0..3
    #   kw=0 -> odd half of left pair, kw=1/2 -> this pair, kw=3 -> even half of right pair
    z = jnp.concatenate([left[..., c:], y, right[..., :c]], axis=-1)      # (NB,H,Wo,4C)

    # Zero padding along H, then split rows by parity of the padded row index.
    zrow = jnp.zeros((nb, 1, wo, 4 * c), dtype=z.dtype)
    zp = jnp.concatenate([zrow, z, zrow], axis=1)                         # (NB,H+2,Wo,4C)
    zp = zp.reshape(nb, ho + 1, 2, wo, 4 * c)                             # cheap: leading dim split
    ze = zp[:, :, 0]                                                      # padded rows 0,2,...  (NB,Ho+1,Wo,4C)
    zo = zp[:, :, 1]                                                      # padded rows 1,3,...

    # im2col patches, tap order (kh, kw, ci) -- matches the folded weight matrix.
    p = jnp.concatenate([ze[:, :ho], zo[:, :ho], ze[:, 1:], zo[:, 1:]], axis=-1)  # (NB,Ho,Wo,16C)
    p = p.reshape(nb * ho * wo, 16 * c)

    # Single stacked-tap MXU matmul + bias (bias folded in-kernel).
    acc = jnp.dot(p, w_ref[...], preferred_element_type=jnp.float32)      # (NB*Ho*Wo, Cout)
    acc = acc + b_ref[...]
    o_ref[...] = acc.reshape(o_ref.shape).astype(o_ref.dtype)


@functools.partial(
    jax.jit, static_argnames=("input_resolution", "batch_block", "vmem_limit_bytes"))
def downsample(x, weight, bias, input_resolution, *,
               batch_block=None, vmem_limit_bytes=32 * 1024 * 1024):
    """x: (B, H*W, Cin); weight: (Cout, Cin, 4, 4); bias: (Cout,).

    Returns (B, (H/2)*(W/2), Cout), matching the PyTorch Downsample module.
    """
    B, L, cin = x.shape
    H, W = input_resolution
    assert L == H * W, "input length must equal H*W"
    assert H % 2 == 0 and W % 2 == 0, "resolution must be even for stride-2 downsample"
    cout = weight.shape[0]
    assert weight.shape == (cout, cin, 4, 4)
    ho, wo = H // 2, W // 2
    l_out = ho * wo

    # Free reshape: pack adjacent column pairs onto the lane axis.
    x4 = x.reshape(B, H, wo, 2 * cin)
    # Fold all 16 taps into one matrix: (Cout,Cin,4,4) -> (kh,kw,ci,co) -> (16C, Cout).
    wmat = jnp.transpose(weight, (2, 3, 1, 0)).reshape(16 * cin, cout)
    b2 = bias.reshape(1, cout)

    # Batch-block several images per grid step (amortize per-step overhead),
    # while keeping the per-step working set small for every TPU generation.
    if batch_block is None:
        per_image = H * W * cin * 4 * 12            # x block + im2col intermediates
        nb = max(1, min(B, (8 * 1024 * 1024) // max(per_image, 1)))
        while B % nb:
            nb -= 1
    else:
        nb = batch_block
        assert B % nb == 0
    grid = (B // nb,)

    grid_spec = pltpu.PrefetchScalarGridSpec(
        num_scalar_prefetch=0,
        grid=grid,
        in_specs=[
            pl.BlockSpec((nb, H, wo, 2 * cin), lambda n: (n, 0, 0, 0)),
            # NOTE: weights/bias are tiny here; for large C consider
            # pipeline_mode=pl.Buffered(1) to avoid double-buffered constants.
            pl.BlockSpec((16 * cin, cout), lambda n: (0, 0)),
            pl.BlockSpec((1, cout), lambda n: (0, 0)),
        ],
        out_specs=pl.BlockSpec((nb, l_out, cout), lambda n: (n, 0, 0)),
    )
    return pl.pallas_call(
        _downsample_kernel,
        out_shape=jax.ShapeDtypeStruct((B, l_out, cout), x.dtype),
        grid_spec=grid_spec,
        compiler_params=pltpu.CompilerParams(
            dimension_semantics=("parallel",),
            vmem_limit_bytes=vmem_limit_bytes),
    )(x4, wmat, b2)


def _reference(x, weight, bias, input_resolution):
    """Pure-JAX mirror of the PyTorch forward (circular W pad, zero H pad, conv)."""
    H, W = input_resolution
    B, L, cin = x.shape
    cout = weight.shape[0]
    x4 = jnp.transpose(x, (0, 2, 1)).reshape(B, cin, H, W)
    xp = jnp.concatenate([x4[..., -1:], x4, x4[..., :1]], axis=-1)   # circular pad W by (1,1)
    xp = jnp.pad(xp, ((0, 0), (0, 0), (1, 1), (0, 0)))               # zero pad H by (1,1)
    y = jax.lax.conv_general_dilated(
        xp, weight, window_strides=(2, 2), padding="VALID",
        dimension_numbers=("NCHW", "OIHW", "NCHW"),
        precision=jax.lax.Precision.HIGHEST)
    y = y + bias[None, :, None, None]
    return jnp.transpose(y.reshape(B, cout, -1), (0, 2, 1))


if __name__ == "__main__":
    B, Cin, Cout = 2, 4, 8
    H, W = 16, 16

    key = jax.random.PRNGKey(0)
    kx, kwt, kb = jax.random.split(key, 3)
    x = jax.random.normal(kx, (B, H * W, Cin), dtype=jnp.float32)
    weight = jax.random.normal(kwt, (Cout, Cin, 4, 4), dtype=jnp.float32) * 0.1
    bias = jax.random.normal(kb, (Cout,), dtype=jnp.float32) * 0.1

    out = jax.block_until_ready(downsample(x, weight, bias, (H, W)))
    ref = jax.block_until_ready(_reference(x, weight, bias, (H, W)))

    assert out.shape == (B, (H // 2) * (W // 2), Cout)
    err = float(np.max(np.abs(np.asarray(out) - np.asarray(ref))))
    assert np.allclose(np.asarray(out), np.asarray(ref), rtol=1e-3, atol=1e-3), err

    print("KERNEL_OK")
</pallas_src>

<mosaic_0001>
module attributes {stable_mosaic.version = 11 : i64} {
  func.func @_downsample_kernel(%arg0: i32, %arg1: memref<2x16x8x8xf32, #tpu.memory_space<vmem>>, %arg2: memref<64x8xf32, #tpu.memory_space<vmem>>, %arg3: memref<1x8xf32, #tpu.memory_space<vmem>>, %arg4: memref<2x64x8xf32, #tpu.memory_space<vmem>>) attributes {dimension_semantics = [#tpu.dimension_semantics<parallel>], iteration_bounds = array<i64: 1>, scalar_prefetch = 0 : i64, scratch_operands = 0 : i64, tpu.core_type = #tpu.core_type<tc>, window_params = [{transform_indices = @transform_0, window_bounds = array<i64: 2, 16, 8, 8>}, {pipeline_mode = #tpu.pipeline_mode<synchronous>, transform_indices = @transform_1, window_bounds = array<i64: 64, 8>}, {pipeline_mode = #tpu.pipeline_mode<synchronous>, transform_indices = @transform_2, window_bounds = array<i64: 1, 8>}, {transform_indices = @transform_3, window_bounds = array<i64: 2, 64, 8>}]} {
    %c0 = arith.constant 0 : index
    %c0_0 = arith.constant 0 : index
    %c0_1 = arith.constant 0 : index
    %c0_2 = arith.constant 0 : index
    %0 = vector.load %arg1[%c0, %c0_0, %c0_1, %c0_2] : memref<2x16x8x8xf32, #tpu.memory_space<vmem>>, vector<2x16x8x8xf32>
    %1 = vector.extract_strided_slice %0 {offsets = [0, 0, 7, 0], sizes = [2, 16, 1, 8], strides = [1, 1, 1, 1]} : vector<2x16x8x8xf32> to vector<2x16x1x8xf32>
    %2 = vector.extract_strided_slice %0 {offsets = [0, 0, 0, 0], sizes = [2, 16, 7, 8], strides = [1, 1, 1, 1]} : vector<2x16x8x8xf32> to vector<2x16x7x8xf32>
    %3 = tpu.concatenate %1, %2 in 2 : vector<2x16x1x8xf32>, vector<2x16x7x8xf32> -> vector<2x16x8x8xf32>
    %4 = vector.extract_strided_slice %0 {offsets = [0, 0, 1, 0], sizes = [2, 16, 7, 8], strides = [1, 1, 1, 1]} : vector<2x16x8x8xf32> to vector<2x16x7x8xf32>
    %5 = vector.extract_strided_slice %0 {offsets = [0, 0, 0, 0], sizes = [2, 16, 1, 8], strides = [1, 1, 1, 1]} : vector<2x16x8x8xf32> to vector<2x16x1x8xf32>
    %6 = tpu.concatenate %4, %5 in 2 : vector<2x16x7x8xf32>, vector<2x16x1x8xf32> -> vector<2x16x8x8xf32>
    %7 = vector.extract_strided_slice %3 {offsets = [0, 0, 0, 4], sizes = [2, 16, 8, 4], strides = [1, 1, 1, 1]} : vector<2x16x8x8xf32> to vector<2x16x8x4xf32>
    %8 = vector.extract_strided_slice %6 {offsets = [0, 0, 0, 0], sizes = [2, 16, 8, 4], strides = [1, 1, 1, 1]} : vector<2x16x8x8xf32> to vector<2x16x8x4xf32>
    %9 = tpu.concatenate %7, %0, %8 in 3 : vector<2x16x8x4xf32>, vector<2x16x8x8xf32>, vector<2x16x8x4xf32> -> vector<2x16x8x16xf32>
    %cst = arith.constant 0.000000e+00 : f32
    %10 = vector.broadcast %cst : f32 to vector<2x1x8x16xf32>
    %11 = tpu.concatenate %10, %9, %10 in 1 : vector<2x1x8x16xf32>, vector<2x16x8x16xf32>, vector<2x1x8x16xf32> -> vector<2x18x8x16xf32>
    %12 = vector.shape_cast %11 : vector<2x18x8x16xf32> to vector<2x9x2x8x16xf32>
    %13 = vector.extract_strided_slice %12 {offsets = [0, 0, 0, 0, 0], sizes = [2, 9, 1, 8, 16], strides = [1, 1, 1, 1, 1]} : vector<2x9x2x8x16xf32> to vector<2x9x1x8x16xf32>
    %14 = vector.shape_cast %13 : vector<2x9x1x8x16xf32> to vector<2x9x8x16xf32>
    %15 = vector.extract_strided_slice %12 {offsets = [0, 0, 1, 0, 0], sizes = [2, 9, 1, 8, 16], strides = [1, 1, 1, 1, 1]} : vector<2x9x2x8x16xf32> to vector<2x9x1x8x16xf32>
    %16 = vector.shape_cast %15 : vector<2x9x1x8x16xf32> to vector<2x9x8x16xf32>
    %17 = vector.extract_strided_slice %14 {offsets = [0, 0, 0, 0], sizes = [2, 8, 8, 16], strides = [1, 1, 1, 1]} : vector<2x9x8x16xf32> to vector<2x8x8x16xf32>
    %18 = vector.extract_strided_slice %16 {offsets = [0, 0, 0, 0], sizes = [2, 8, 8, 16], strides = [1, 1, 1, 1]} : vector<2x9x8x16xf32> to vector<2x8x8x16xf32>
    %19 = vector.extract_strided_slice %14 {offsets = [0, 1, 0, 0], sizes = [2, 8, 8, 16], strides = [1, 1, 1, 1]} : vector<2x9x8x16xf32> to vector<2x8x8x16xf32>
    %20 = vector.extract_strided_slice %16 {offsets = [0, 1, 0, 0], sizes = [2, 8, 8, 16], strides = [1, 1, 1, 1]} : vector<2x9x8x16xf32> to vector<2x8x8x16xf32>
    %21 = tpu.concatenate %17, %18, %19, %20 in 3 : vector<2x8x8x16xf32>, vector<2x8x8x16xf32>, vector<2x8x8x16xf32>, vector<2x8x8x16xf32> -> vector<2x8x8x64xf32>
    %22 = vector.shape_cast %21 : vector<2x8x8x64xf32> to vector<128x64xf32>
    %c0_3 = arith.constant 0 : index
    %c0_4 = arith.constant 0 : index
    %23 = vector.load %arg2[%c0_3, %c0_4] : memref<64x8xf32, #tpu.memory_space<vmem>>, vector<64x8xf32>
    %cst_5 = arith.constant dense<0.000000e+00> : vector<128x8xf32>
    %24 = tpu.matmul %22, %23, %cst_5 {dimension_numbers = #tpu.dot_dimension_numbers<[1], [0], [0], [1], [0, 0, 1, 1], [], []>} : vector<128x64xf32>, vector<64x8xf32>, vector<128x8xf32> -> vector<128x8xf32>
    %c0_6 = arith.constant 0 : index
    %c0_7 = arith.constant 0 : index
    %25 = vector.load %arg3[%c0_6, %c0_7] : memref<1x8xf32, #tpu.memory_space<vmem>>, vector<1x8xf32>
    %26 = vector.broadcast %25 : vector<1x8xf32> to vector<128x8xf32>
    %27 = arith.addf %24, %26 : vector<128x8xf32>
    %28 = vector.shape_cast %27 : vector<128x8xf32> to vector<2x64x8xf32>
    %c0_8 = arith.constant 0 : index
    %c0_9 = arith.constant 0 : index
    %c0_10 = arith.constant 0 : index
    %29 = vector.load %arg4[%c0_8, %c0_9, %c0_10] : memref<2x64x8xf32, #tpu.memory_space<vmem>>, vector<2x64x8xf32>
    tpu.vector_store %arg4[%c0_8, %c0_9, %c0_10], %28 {strides = array<i32>} : memref<2x64x8xf32, #tpu.memory_space<vmem>>, vector<2x64x8xf32>,
    return
  }
  func.func @transform_0(%arg0: i32) -> (i32, i32, i32, i32) {
    %c0_i32 = arith.constant 0 : i32
    %c0_i32_0 = arith.constant 0 : i32
    %c0_i32_1 = arith.constant 0 : i32
    %c0_i32_2 = arith.constant 0 : i32
    return %arg0, %c0_i32, %c0_i32_0, %c0_i32_1 : i32, i32, i32, i32
  }
  func.func @transform_1(%arg0: i32) -> (i32, i32) {
    %c0_i32 = arith.constant 0 : i32
    %c0_i32_0 = arith.constant 0 : i32
    %c0_i32_1 = arith.constant 0 : i32
    return %c0_i32, %c0_i32_0 : i32, i32
  }
  func.func @transform_2(%arg0: i32) -> (i32, i32) {
    %c0_i32 = arith.constant 0 : i32
    %c0_i32_0 = arith.constant 0 : i32
    %c0_i32_1 = arith.constant 0 : i32
    return %c0_i32, %c0_i32_0 : i32, i32
  }
  func.func @transform_3(%arg0: i32) -> (i32, i32, i32) {
    %c0_i32 = arith.constant 0 : i32
    %c0_i32_0 = arith.constant 0 : i32
    %c0_i32_1 = arith.constant 0 : i32
    return %arg0, %c0_i32, %c0_i32_0 : i32, i32, i32
  }
}

</mosaic_0001>

<bundles_post_ra>
// kernel: downsample.1
= control target key start
LH: loop header
LB: loop body
LE: loop exit
PB: predicated region body
PF: predicated region fallthrough
CT: control target
= control target key end

     0   :  { %s1249_s16 = smov 4   ;;  %s1250_s19 = smov 124   ;;  %vm657_vm0 = vcmask 97280   ;;  %vm624_vm1 = vcmask 31744   ;;  %vm864_vm2 = vcmask 130048   ;;  %vm881_vm3 = vcmask 261120   ;;  %s1916_s0 = inlined_call_operand.vmem [shape: f32[2,16,8,8], index: 0, kind: input, shape index: {}]   ;;  %s1917_s1 = inlined_call_operand.vmem [shape: f32[64,8], index: 1, kind: input, shape index: {}]   ;;  %s1918_s2 = inlined_call_operand.vmem [shape: f32[1,8], index: 2, kind: input, shape index: {}]   ;;  %s1919_s3 = inlined_call_operand.vmem [shape: f32[2,64,8], index: 3, kind: output, shape index: {}]  }
   0x1   :  { %v14_v0 = vld [vmem:[%s1916_s0] sm:$0xff]  ;;  %v16_v3 = vld [vmem:[%s1916_s0 + $0x10] sm:$0xff]  ;;  %v15_v5 = vld [vmem:[%s1916_s0 + $0x8] sm:$0xff]  ;;  %s1251_s30 = smov 12   ;;  %s1252_s11 = smov 16   ;;  %vm898_vm4 = vcmask 392192  }
   0x2   :  { %v30_v1 = vld [vmem:[%s1916_s0 + $0x80] sm:$0xff]  ;;  %400 = vrot.lane.b32.xlu1 %v14_v0, %s1249_s16  ;;  %v78_v2 = vrot.slane %v14_v0, 7  ;;  %v80_v6 = vrot.slane %v16_v3, 7  ;;  %v32_v7 = vld [vmem:[%s1916_s0 + $0x90] sm:$0xff]  ;;  %v79_v8 = vrot.slane %v15_v5, 7  ;;  %v31_v9 = vld [vmem:[%s1916_s0 + $0x88] sm:$0xff] }
   0x3   :  { %v94_v4 = vrot.slane %v30_v1, 7  ;;  %v96_v10 = vrot.slane %v32_v7, 7  ;;  %v95_v11 = vrot.slane %v31_v9, 7  ;;  %v191_v12 = vrot.slane %v30_v1, 1  ;;  %v33_v13 = vld [vmem:[%s1916_s0 + $0x98] sm:$0xff]  ;;  %v34_v21 = vld [vmem:[%s1916_s0 + $0xa0] sm:$0xff] }
   0x4   :  { %304 = vrot.lane.b32.xlu0 %v78_v2, %s1250_s19  ;;  %v175_v14 = vrot.slane %v14_v0, 1  ;;  %v17_v15 = vld [vmem:[%s1916_s0 + $0x18] sm:$0xff]  ;;  %v97_v16 = vrot.slane %v33_v13, 7  ;;  %v177_v18 = vrot.slane %v16_v3, 1  ;;  %v176_v19 = vrot.slane %v15_v5, 1  ;;  %v18_v23 = vld [vmem:[%s1916_s0 + $0x20] sm:$0xff] }
   0x5   :  { %v81_v17 = vrot.slane %v17_v15, 7  ;;  %v193_v20 = vrot.slane %v32_v7, 1  ;;  %v192_v22 = vrot.slane %v31_v9, 1  ;;  %v98_v24 = vrot.slane %v34_v21, 7  ;;  %v20_v29 = vld [vmem:[%s1916_s0 + $0x30] sm:$0xff]  ;;  %v19_v31 = vld [vmem:[%s1916_s0 + $0x28] sm:$0xff] }
   0x6   :  { %432 = vrot.lane.b32.xlu1 %v30_v1, %s1249_s16  ;;  %v82_v25 = vrot.slane %v18_v23, 7  ;;  %v194_v26 = vrot.slane %v33_v13, 1  ;;  %v178_v27 = vrot.slane %v17_v15, 1  ;;  %v195_v28 = vrot.slane %v34_v21, 1  ;;  %v36_v33 = vld [vmem:[%s1916_s0 + $0xb0] sm:$0xff]  ;;  %v35_v35 = vld [vmem:[%s1916_s0 + $0xa8] sm:$0xff] }
   0x7   :  { %v179_v30 = vrot.slane %v18_v23, 1  ;;  %v84_v32 = vrot.slane %v20_v29, 7  ;;  %v83_v34 = vrot.slane %v19_v31, 7  ;;  %v100_v36 = vrot.slane %v36_v33, 7  ;;  %v37_v38 = vld [vmem:[%s1916_s0 + $0xb8] sm:$0xff]  ;;  %v38_v45 = vld [vmem:[%s1916_s0 + $0xc0] sm:$0xff] }
   0x8   :  { %336 = vrot.lane.b32.xlu0 %v94_v4, %s1250_s19  ;;  %v99_v37 = vrot.slane %v35_v35, 7  ;;  %v21_v39 = vld [vmem:[%s1916_s0 + $0x38] sm:$0xff]  ;;  %v101_v40 = vrot.slane %v37_v38, 7  ;;  %v181_v42 = vrot.slane %v20_v29, 1  ;;  %v180_v43 = vrot.slane %v19_v31, 1  ;;  %v22_v47 = vld [vmem:[%s1916_s0 + $0x40] sm:$0xff] }
   0x9   :  { %v85_v41 = vrot.slane %v21_v39, 7  ;;  %v197_v44 = vrot.slane %v36_v33, 1  ;;  %v196_v46 = vrot.slane %v35_v35, 1  ;;  %v102_v48 = vrot.slane %v38_v45, 7  ;;  %v24_v53 = vld [vmem:[%s1916_s0 + $0x50] sm:$0xff]  ;;  %v23_v55 = vld [vmem:[%s1916_s0 + $0x48] sm:$0xff] }
   0xa   :  { %308 = vrot.lane.b32.xlu1 %v80_v6, %s1250_s19  ;;  %v86_v49 = vrot.slane %v22_v47, 7  ;;  %v198_v50 = vrot.slane %v37_v38, 1  ;;  %v182_v51 = vrot.slane %v21_v39, 1  ;;  %v199_v52 = vrot.slane %v38_v45, 1  ;;  %v40_v57 = vld [vmem:[%s1916_s0 + $0xd0] sm:$0xff]  ;;  %v39_v59 = vld [vmem:[%s1916_s0 + $0xc8] sm:$0xff] }
   0xb   :  { %v183_v54 = vrot.slane %v22_v47, 1  ;;  %v88_v56 = vrot.slane %v24_v53, 7  ;;  %v87_v58 = vrot.slane %v23_v55, 7  ;;  %v104_v60 = vrot.slane %v40_v57, 7  ;;  %v41_v0 = vld [vmem:[%s1916_s0 + $0xd8] sm:$0xff]  ;;  %s1253_s18 = smov 32  }
   0xc   :  { %306 = vrot.lane.b32.xlu0 %v79_v8, %s1250_s19  ;;  %v103_v61 = vrot.slane %v39_v59, 7  ;;  %v25_v2 = vld [vmem:[%s1916_s0 + $0x58] sm:$0xff]  ;;  %v105_v4 = vrot.slane %v41_v0, 7  ;;  %vm930_vm5 = vcmask 523264   ;;  %vm1124_vm6 = vcmask 64512  }
   0xd   :  { %v89_v6 = vrot.slane %v25_v2, 7 }
   0xe   :  { %340 = vrot.lane.b32.xlu1 %v96_v10, %s1250_s19  ;;  %v185_v10 = vrot.slane %v24_v53, 1 }
  0x10   :  { %338 = vrot.lane.b32.xlu0 %v95_v11, %s1250_s19 }
  0x12   :  { %404 = vrot.lane.b32.xlu1 %v16_v3, %s1249_s16 }
  0x14   :  { %402 = vrot.lane.b32.xlu0 %v15_v5, %s1249_s16 }
  0x16   :  { %436 = vrot.lane.b32.xlu1 %v32_v7, %s1249_s16 }
  0x18   :  { %434 = vrot.lane.b32.xlu0 %v31_v9, %s1249_s16 }
  0x1a   :  { %560 = vrot.lane.b32.xlu1 %v191_v12, %s1251_s30  ;;  %v184_v12 = vrot.slane %v23_v55, 1 }
  0x1c   :  { %528 = vrot.lane.b32.xlu0 %v175_v14, %s1251_s30  ;;  %v201_v14 = vrot.slane %v40_v57, 1 }
  0x1e   :  { %342 = vrot.lane.b32.xlu1 %v97_v16, %s1250_s19 }
  0x20   :  { %310 = vrot.lane.b32.xlu0 %v81_v17, %s1250_s19  ;;  %v200_v17 = vrot.slane %v39_v59, 1 }
  0x22   :  { %438 = vrot.lane.b32.xlu1 %v33_v13, %s1249_s16 }
  0x24   :  { %406 = vrot.lane.b32.xlu0 %v17_v15, %s1249_s16  ;;  %v42_v15 = vld [vmem:[%s1916_s0 + $0xe0] sm:$0xff] }
  0x26   :  { %532 = vrot.lane.b32.xlu1 %v177_v18, %s1251_s30  ;;  %v26_v18 = vld [vmem:[%s1916_s0 + $0x60] sm:$0xff] }
  0x28   :  { %530 = vrot.lane.b32.xlu0 %v176_v19, %s1251_s30 }
  0x2a   :  { %564 = vrot.lane.b32.xlu1 %v193_v20, %s1251_s30  ;;  %v106_v20 = vrot.slane %v42_v15, 7 }
  0x2c   :  { %562 = vrot.lane.b32.xlu0 %v192_v22, %s1251_s30  ;;  %v90_v22 = vrot.slane %v26_v18, 7 }
  0x2e   :  { %344 = vrot.lane.b32.xlu1 %v98_v24, %s1250_s19 }
  0x30   :  { %312 = vrot.lane.b32.xlu0 %v82_v25, %s1250_s19 }
  0x32   :  { %440 = vrot.lane.b32.xlu1 %v34_v21, %s1249_s16 }
  0x34   :  { %408 = vrot.lane.b32.xlu0 %v18_v23, %s1249_s16 }
  0x36   :  { %566 = vrot.lane.b32.xlu1 %v194_v26, %s1251_s30  ;;  %v202_v26 = vrot.slane %v41_v0, 1 }
  0x38   :  { %534 = vrot.lane.b32.xlu0 %v178_v27, %s1251_s30 }
  0x3a   :  { %568 = vrot.lane.b32.xlu1 %v195_v28, %s1251_s30  ;;  %v186_v28 = vrot.slane %v25_v2, 1 }
  0x3c   :  { %536 = vrot.lane.b32.xlu0 %v179_v30, %s1251_s30  ;;  %v203_v30 = vrot.slane %v42_v15, 1 }
  0x3e   :  { %316 = vrot.lane.b32.xlu1 %v84_v32, %s1250_s19 }
  0x40   :  { %314 = vrot.lane.b32.xlu0 %v83_v34, %s1250_s19  ;;  %v27_v34 = vld [vmem:[%s1916_s0 + $0x68] sm:$0xff] }
  0x42   :  { %348 = vrot.lane.b32.xlu1 %v100_v36, %s1250_s19 }
  0x44   :  { %346 = vrot.lane.b32.xlu0 %v99_v37, %s1250_s19  ;;  %v44_v37 = vld [vmem:[%s1916_s0 + $0xf0] sm:$0xff] }
  0x46   :  { %412 = vrot.lane.b32.xlu1 %v20_v29, %s1249_s16 }
  0x48   :  { %410 = vrot.lane.b32.xlu0 %v19_v31, %s1249_s16  ;;  %v28_v31 = vld [vmem:[%s1916_s0 + $0x70] sm:$0xff] }
  0x49   :  { %v92_v36 = vrot.slane %v28_v31, 7 }
  0x4a   :  { %444 = vrot.lane.b32.xlu1 %v36_v33, %s1249_s16  ;;  %v187_v33 = vrot.slane %v26_v18, 1 }
  0x4c   :  { %442 = vrot.lane.b32.xlu0 %v35_v35, %s1249_s16 }
  0x4e   :  { %350 = vrot.lane.b32.xlu1 %v101_v40, %s1250_s19  ;;  %v43_v40 = vld [vmem:[%s1916_s0 + $0xe8] sm:$0xff] }
  0x50   :  { %318 = vrot.lane.b32.xlu0 %v85_v41, %s1250_s19 }
  0x52   :  { %446 = vrot.lane.b32.xlu1 %v37_v38, %s1249_s16 }
  0x54   :  { %414 = vrot.lane.b32.xlu0 %v21_v39, %s1249_s16  ;;  %v91_v39 = vrot.slane %v27_v34, 7 }
  0x56   :  { %540 = vrot.lane.b32.xlu1 %v181_v42, %s1251_s30  ;;  %v108_v42 = vrot.slane %v44_v37, 7 }
  0x58   :  { %538 = vrot.lane.b32.xlu0 %v180_v43, %s1251_s30 }
  0x5a   :  { %572 = vrot.lane.b32.xlu1 %v197_v44, %s1251_s30  ;;  %v107_v44 = vrot.slane %v43_v40, 7 }
  0x5c   :  { %570 = vrot.lane.b32.xlu0 %v196_v46, %s1251_s30 }
  0x5e   :  { %352 = vrot.lane.b32.xlu1 %v102_v48, %s1250_s19  ;;  %v45_v48 = vld [vmem:[%s1916_s0 + $0xf8] sm:$0xff] }
  0x60   :  { %320 = vrot.lane.b32.xlu0 %v86_v49, %s1250_s19 }
  0x62   :  { %448 = vrot.lane.b32.xlu1 %v38_v45, %s1249_s16 }
  0x64   :  { %416 = vrot.lane.b32.xlu0 %v22_v47, %s1249_s16 }
  0x66   :  { %574 = vrot.lane.b32.xlu1 %v198_v50, %s1251_s30  ;;  %v29_v50 = vld [vmem:[%s1916_s0 + $0x78] sm:$0xff] }
  0x68   :  { %542 = vrot.lane.b32.xlu0 %v182_v51, %s1251_s30 }
  0x6a   :  { %576 = vrot.lane.b32.xlu1 %v199_v52, %s1251_s30  ;;  %v109_v52 = vrot.slane %v45_v48, 7 }
  0x6c   :  { %544 = vrot.lane.b32.xlu0 %v183_v54, %s1251_s30  ;;  %v93_v54 = vrot.slane %v29_v50, 7 }
  0x6e   :  { %324 = vrot.lane.b32.xlu1 %v88_v56, %s1250_s19 }
  0x70   :  { %322 = vrot.lane.b32.xlu0 %v87_v58, %s1250_s19  ;;  %v189_v58 = vrot.slane %v28_v31, 1 }
  0x72   :  { %356 = vrot.lane.b32.xlu1 %v104_v60, %s1250_s19  ;;  %v188_v60 = vrot.slane %v27_v34, 1 }
  0x74   :  { %v1399_v62 = vpop.permute.xlu1 %400  ;;  %354 = vrot.lane.b32.xlu0 %v103_v61, %s1250_s19 }
  0x76   :  { %420 = vrot.lane.b32.xlu1 %v24_v53, %s1249_s16  ;;  %v1403_v63 = vpop.permute.xlu0 %304 }
  0x78   :  { %v1408_v1 = vpop.permute.xlu1 %432  ;;  %418 = vrot.lane.b32.xlu0 %v23_v55, %s1249_s16 }
  0x7a   :  { %452 = vrot.lane.b32.xlu1 %v40_v57, %s1249_s16  ;;  %v1415_v3 = vpop.permute.xlu0 %336 }
  0x7c   :  { %v1417_v5 = vpop.permute.xlu1 %308  ;;  %450 = vrot.lane.b32.xlu0 %v39_v59, %s1249_s16 }
  0x7e   :  { %358 = vrot.lane.b32.xlu1 %v105_v4, %s1250_s19  ;;  %v1421_v7 = vpop.permute.xlu0 %306  ;;  %v204_v4 = vrot.slane %v43_v40, 1 }
  0x80   :  { %v1423_v8 = vpop.permute.xlu1 %340  ;;  %326 = vrot.lane.b32.xlu0 %v89_v6, %s1250_s19  ;;  %v922_v6 = vld [vmem:[%s1917_s1 + $0x38] sm:$0xff] }
  0x81   :  { %1226 = vmatprep.subr.mxu1 %v922_v6  ;;  %1186 = vmatprep.subr.mxu0 %v922_v6 }
  0x82   :  { %454 = vrot.lane.b32.xlu1 %v41_v0, %s1249_s16  ;;  %v1427_v9 = vpop.permute.xlu0 %338  ;;  %v205_v0 = vrot.slane %v44_v37, 1  ;;  %1234 = vmatpush3.msra.mxu1 %v922_v6 }
  0x83   :  { %1187 = vmatpush3.msra.mxu0 %v922_v6 }
  0x84   :  { %v1429_v11 = vpop.permute.xlu1 %404  ;;  %422 = vrot.lane.b32.xlu0 %v25_v2, %s1249_s16 }
  0x86   :  { %548 = vrot.lane.b32.xlu1 %v185_v10, %s1251_s30  ;;  %v1433_v13 = vpop.permute.xlu0 %402 }
  0x88   :  { %v1438_v16 = vpop.permute.xlu1 %436  ;;  %546 = vrot.lane.b32.xlu0 %v184_v12, %s1251_s30  ;;  %v206_v12 = vrot.slane %v45_v48, 1 }
  0x8a   :  { %580 = vrot.lane.b32.xlu1 %v201_v14, %s1251_s30  ;;  %v1445_v19 = vpop.permute.xlu0 %434  ;;  %v921_v14 = vld [vmem:[%s1917_s1 + $0x30] sm:$0xff] }
  0x8b   :  { %1227 = vmatprep.subr.mxu1 %v921_v14  ;;  %1188 = vmatprep.subr.mxu0 %v921_v14 }
  0x8c   :  { %v1447_v21 = vpop.permute.xlu1 %560  ;;  %578 = vrot.lane.b32.xlu0 %v200_v17, %s1251_s30  ;;  %v190_v17 = vrot.slane %v29_v50, 1  ;;  %1235 = vmatpush3.msra.mxu1 %v921_v14 }
  0x8d   :  { %1189 = vmatpush3.msra.mxu0 %v921_v14 }
  0x8e   :  { %360 = vrot.lane.b32.xlu1 %v106_v20, %s1250_s19  ;;  %v1451_v23 = vpop.permute.xlu0 %528 }
  0x90   :  { %v1453_v24 = vpop.permute.xlu1 %342  ;;  %328 = vrot.lane.b32.xlu0 %v90_v22, %s1250_s19  ;;  %v919_v22 = vld [vmem:[%s1917_s1 + $0x20] sm:$0xff] }
  0x92   :  { %456 = vrot.lane.b32.xlu1 %v42_v15, %s1249_s16  ;;  %v1457_v25 = vpop.permute.xlu0 %310 }
  0x94   :  { %v1459_v27 = vpop.permute.xlu1 %438  ;;  %424 = vrot.lane.b32.xlu0 %v26_v18, %s1249_s16  ;;  %v920_v18 = vld [vmem:[%s1917_s1 + $0x28] sm:$0xff] }
  0x95   :  { %1228 = vmatprep.subr.mxu1 %v920_v18  ;;  %1190 = vmatprep.subr.mxu0 %v920_v18 }
  0x96   :  { %582 = vrot.lane.b32.xlu1 %v202_v26, %s1251_s30  ;;  %v1463_v29 = vpop.permute.xlu0 %406  ;;  %v641_v26 = vsel %vm624_vm1, %v1415_v3, %v1408_v1  ;;  %1236 = vmatpush3.msra.mxu1 %v920_v18 }
  0x97   :  { %1229 = vmatprep.subr.mxu1 %v919_v22  ;;  %1191 = vmatpush3.msra.mxu0 %v920_v18 }
  0x98   :  { %v1468_v32 = vpop.permute.xlu1 %532  ;;  %550 = vrot.lane.b32.xlu0 %v186_v28, %s1251_s30  ;;  %1237 = vmatpush3.msra.mxu1 %v919_v22 }
  0x99   :  { %1192 = vmatprep.subr.mxu0 %v919_v22 }
  0x9a   :  { %584 = vrot.lane.b32.xlu1 %v203_v30, %s1251_s30  ;;  %v1475_v35 = vpop.permute.xlu0 %530  ;;  %v674_v30 = vsel %vm657_vm0, %v641_v26, %v1447_v21  ;;  %v643_v21 = vsel %vm624_vm1, %v1423_v8, %v1438_v16  ;;  %1193 = vmatpush3.msra.mxu0 %v919_v22  ;;  %v916_v16 = vld [vmem:[%s1917_s1 + $0x8] sm:$0xff] }
  0x9c   :  { %v1480_v38 = vpop.permute.xlu1 %564  ;;  %552 = vrot.lane.b32.xlu0 %v187_v33, %s1251_s30  ;;  %v625_v33 = vsel %vm624_vm1, %v1403_v63, %v1399_v62  ;;  %v917_v62 = vld [vmem:[%s1917_s1 + $0x10] sm:$0xff] }
  0x9d   :  { %v658_v3 = vsel %vm657_vm0, %v625_v33, %v1451_v23  ;;  %v676_v63 = vsel %vm657_vm0, %v643_v21, %v1480_v38  ;;  %v627_v23 = vsel %vm624_vm1, %v1417_v5, %v1429_v11  ;;  %v915_v11 = vld [vmem:[%s1917_s1] sm:$0xff] }
  0x9e   :  { %332 = vrot.lane.b32.xlu1 %v92_v36, %s1250_s19  ;;  %v1487_v41 = vpop.permute.xlu0 %562  ;;  %v660_v36 = vsel %vm657_vm0, %v627_v23, %v1468_v32  ;;  %v626_v32 = vsel %vm624_vm1, %v1421_v7, %v1433_v13  ;;  %v628_v13 = vsel %vm624_vm1, %v1457_v25, %v1463_v29 }
  0xa0   :  { %v1489_v43 = vpop.permute.xlu1 %344  ;;  %330 = vrot.lane.b32.xlu0 %v91_v39, %s1250_s19  ;;  %v644_v39 = vsel %vm624_vm1, %v1453_v24, %v1459_v27 }
  0xa2   :  { %364 = vrot.lane.b32.xlu1 %v108_v42, %s1250_s19  ;;  %v1493_v45 = vpop.permute.xlu0 %312 }
  0xa4   :  { %v1495_v46 = vpop.permute.xlu1 %440  ;;  %362 = vrot.lane.b32.xlu0 %v107_v44, %s1250_s19 }
  0xa5   :  { %v645_v25 = vsel %vm624_vm1, %v1489_v43, %v1495_v46 }
  0xa6   :  { %428 = vrot.lane.b32.xlu1 %v28_v31, %s1249_s16  ;;  %v1499_v47 = vpop.permute.xlu0 %408  ;;  %v918_v31 = vld [vmem:[%s1917_s1 + $0x18] sm:$0xff]  ;;  %s1254_s1 = smov 48  }
  0xa7   :  { %1230 = vmatprep.subr.mxu1 %v918_v31  ;;  %1194 = vmatprep.subr.mxu0 %v918_v31  ;;  %v629_v44 = vsel %vm624_vm1, %v1493_v45, %v1499_v47 }
  0xa8   :  { %v1504_v49 = vpop.permute.xlu1 %566  ;;  %426 = vrot.lane.b32.xlu0 %v27_v34, %s1249_s16  ;;  %1238 = vmatpush3.msra.mxu1 %v918_v31 }
  0xa9   :  { %1231 = vmatprep.subr.mxu1 %v917_v62  ;;  %1195 = vmatpush3.msra.mxu0 %v918_v31  ;;  %v1623_v7 = vsel %vm657_vm0, %v644_v39, %v1504_v49 }
  0xaa   :  { %460 = vrot.lane.b32.xlu1 %v44_v37, %s1249_s16  ;;  %v1511_v51 = vpop.permute.xlu0 %534  ;;  %v642_v37 = vsel %vm624_vm1, %v1427_v9, %v1445_v19  ;;  %1239 = vmatpush3.msra.mxu1 %v917_v62  ;;  %v1614_v19 = vsel %vm657_vm0, %v626_v32, %v1475_v35 }
  0xab   :  { %v1602_v5 = vsel %vm657_vm0, %v642_v37, %v1487_v41  ;;  %1196 = vmatprep.subr.mxu0 %v917_v62  ;;  %1232 = vmatprep.subr.mxu1 %v916_v16  ;;  %v1632_v24 = vsel %vm657_vm0, %v628_v13, %v1511_v51 }
  0xac   :  { %v1513_v53 = vpop.permute.xlu1 %568  ;;  %458 = vrot.lane.b32.xlu0 %v43_v40, %s1249_s16  ;;  %1197 = vmatpush3.msra.mxu0 %v917_v62 }
  0xad   :  { %1240 = vmatpush3.msra.mxu1 %v916_v16  ;;  %1198 = vmatprep.subr.mxu0 %v916_v16  ;;  %v678_v42 = vsel %vm657_vm0, %v645_v25, %v1513_v53 }
  0xae   :  { %366 = vrot.lane.b32.xlu1 %v109_v52, %s1250_s19  ;;  %v1517_v55 = vpop.permute.xlu0 %536  ;;  %1233 = vmatprep.subr.mxu1 %v915_v11 }
  0xaf   :  { %1199 = vmatpush3.msra.mxu0 %v916_v16  ;;  %1241 = vmatpush3.msra.mxu1 %v915_v11  ;;  %v662_v49 = vsel %vm657_vm0, %v629_v44, %v1517_v55 }
  0xb0   :  { %v1519_v56 = vpop.permute.xlu1 %316  ;;  %334 = vrot.lane.b32.xlu0 %v93_v54, %s1250_s19  ;;  %1200 = vmatprep.subr.mxu0 %v915_v11 }
  0xb1   :  { %1201 = vmatpush3.msra.mxu0 %v915_v11 }
  0xb2   :  { %462 = vrot.lane.b32.xlu1 %v45_v48, %s1249_s16  ;;  %v1523_v57 = vpop.permute.xlu0 %314 }
  0xb4   :  { %v1525_v59 = vpop.permute.xlu1 %348  ;;  %430 = vrot.lane.b32.xlu0 %v29_v50, %s1249_s16 }
  0xb6   :  { %556 = vrot.lane.b32.xlu1 %v189_v58, %s1251_s30  ;;  %v1529_v61 = vpop.permute.xlu0 %346 }
  0xb8   :  { %v1531_v2 = vpop.permute.xlu1 %412  ;;  %554 = vrot.lane.b32.xlu0 %v188_v60, %s1251_s30 }
  0xb9   :  { %v631_v47 = vsel %vm624_vm1, %v1519_v56, %v1531_v2 }
  0xba   :  { %588 = vrot.lane.b32.xlu1 %v205_v0, %s1251_s30  ;;  %v1538_v10 = vpop.permute.xlu0 %410 }
  0xbc   :  { %v1543_v15 = vpop.permute.xlu1 %444  ;;  %586 = vrot.lane.b32.xlu0 %v204_v4, %s1251_s30 }
  0xbd   :  { %v647_v46 = vsel %vm624_vm1, %v1525_v59, %v1543_v15  ;;  %v630_v59 = vsel %vm624_vm1, %v1523_v57, %v1538_v10 }
  0xbe   :  { %590 = vrot.lane.b32.xlu1 %v206_v12, %s1251_s30  ;;  %v1550_v20 = vpop.permute.xlu0 %442 }
  0xbf   :  { %v646_v54 = vsel %vm624_vm1, %v1529_v61, %v1550_v20 }
  0xc0   :  { %v1558_v28 = vpop.permute.xlu1 %350  ;;  %558 = vrot.lane.b32.xlu0 %v190_v17, %s1251_s30 }
  0xc2   :  { %722 = vrot.lane.b32.xlu1 %v674_v30, %s1252_s11  ;;  %v1570_v1 = vpop.permute.xlu0 %318 }
  0xc4   :  { %v1577_v34 = vpop.permute.xlu1 %446  ;;  %706 = vrot.lane.b32.xlu0 %v658_v3, %s1252_s11 }
  0xc5   :  { %v648_v61 = vsel %vm624_vm1, %v1558_v28, %v1577_v34 }
  0xc6   :  { %724 = vrot.lane.b32.xlu1 %v676_v63, %s1252_s11  ;;  %v1589_v8 = vpop.permute.xlu0 %414 }
  0xc7   :  { %v632_v57 = vsel %vm624_vm1, %v1570_v1, %v1589_v8 }
  0xc8   :  { %v541_v38 = vpop.permute.xlu1 %540  ;;  %708 = vrot.lane.b32.xlu0 %v660_v36, %s1252_s11 }
  0xc9   :  { %v664_v53 = vsel %vm657_vm0, %v631_v47, %v541_v38 }
  0xca   :  { %786 = vrot.lane.b32.xlu1 %v1602_v5, %s1253_s18  ;;  %v539_v9 = vpop.permute.xlu0 %538 }
  0xcb   :  { %v1674_v60 = vsel %vm657_vm0, %v630_v59, %v539_v9 }
  0xcc   :  { %v573_v40 = vpop.permute.xlu1 %572  ;;  %770 = vrot.lane.b32.xlu0 %v1614_v19, %s1253_s18 }
  0xcd   :  { %v680_v45 = vsel %vm657_vm0, %v647_v46, %v573_v40 }
  0xce   :  { %788 = vrot.lane.b32.xlu1 %v1623_v7, %s1253_s18  ;;  %v571_v35 = vpop.permute.xlu0 %570 }
  0xcf   :  { %v1666_v58 = vsel %vm657_vm0, %v646_v54, %v571_v35 }
  0xd0   :  { %v353_v27 = vpop.permute.xlu1 %352  ;;  %772 = vrot.lane.b32.xlu0 %v1632_v24, %s1253_s18 }
  0xd2   :  { %835 = vrot.lane.b32.xlu1 %v676_v63, %s1254_s1  ;;  %v321_v41 = vpop.permute.xlu0 %320 }
  0xd4   :  { %v449_v29 = vpop.permute.xlu1 %448  ;;  %819 = vrot.lane.b32.xlu0 %v660_v36, %s1254_s1 }
  0xd5   :  { %v649_v14 = vsel %vm624_vm1, %v353_v27, %v449_v29 }
  0xd6   :  { %837 = vrot.lane.b32.xlu1 %v678_v42, %s1254_s1  ;;  %v417_v48 = vpop.permute.xlu0 %416 }
  0xd7   :  { %v633_v18 = vsel %vm624_vm1, %v321_v41, %v417_v48 }
  0xd8   :  { %v575_v50 = vpop.permute.xlu1 %574  ;;  %821 = vrot.lane.b32.xlu0 %v662_v49, %s1254_s1 }
  0xd9   :  { %v1682_v2 = vsel %vm657_vm0, %v648_v61, %v575_v50 }
  0xda   :  { %726 = vrot.lane.b32.xlu1 %v678_v42, %s1252_s11  ;;  %v543_v43 = vpop.permute.xlu0 %542 }
  0xdb   :  { %v1690_v6 = vsel %vm657_vm0, %v632_v57, %v543_v43 }
  0xdc   :  { %v577_v51 = vpop.permute.xlu1 %576  ;;  %710 = vrot.lane.b32.xlu0 %v662_v49, %s1252_s11 }
  0xdd   :  { %v682_v17 = vsel %vm657_vm0, %v649_v14, %v577_v51 }
  0xde   :  { %728 = vrot.lane.b32.xlu1 %v680_v45, %s1252_s11  ;;  %v545_v52 = vpop.permute.xlu0 %544 }
  0xdf   :  { %v666_v22 = vsel %vm657_vm0, %v633_v18, %v545_v52 }
  0xe0   :  { %v325_v55 = vpop.permute.xlu1 %324  ;;  %712 = vrot.lane.b32.xlu0 %v664_v53, %s1252_s11 }
  0xe2   :  { %790 = vrot.lane.b32.xlu1 %v1666_v58, %s1253_s18  ;;  %v323_v56 = vpop.permute.xlu0 %322 }
  0xe4   :  { %v357_v0 = vpop.permute.xlu1 %356  ;;  %774 = vrot.lane.b32.xlu0 %v1674_v60, %s1253_s18 }
  0xe6   :  { %792 = vrot.lane.b32.xlu1 %v1682_v2, %s1253_s18  ;;  %v355_v4 = vpop.permute.xlu0 %354 }
  0xe8   :  { %v421_v10 = vpop.permute.xlu1 %420  ;;  %776 = vrot.lane.b32.xlu0 %v1690_v6, %s1253_s18 }
  0xe9   :  { %v635_v33 = vsel %vm624_vm1, %v325_v55, %v421_v10 }
  0xea   :  { %839 = vrot.lane.b32.xlu1 %v680_v45, %s1254_s1  ;;  %v419_v12 = vpop.permute.xlu0 %418 }
  0xeb   :  { %v634_v34 = vsel %vm624_vm1, %v323_v56, %v419_v12 }
  0xec   :  { %v453_v15 = vpop.permute.xlu1 %452  ;;  %823 = vrot.lane.b32.xlu0 %v664_v53, %s1254_s1 }
  0xed   :  { %v651_v62 = vsel %vm624_vm1, %v357_v0, %v453_v15 }
  0xee   :  { %841 = vrot.lane.b32.xlu1 %v682_v17, %s1254_s1  ;;  %v451_v20 = vpop.permute.xlu0 %450 }
  0xef   :  { %v650_v36 = vsel %vm624_vm1, %v355_v4, %v451_v20 }
  0xf0   :  { %v359_v26 = vpop.permute.xlu1 %358  ;;  %825 = vrot.lane.b32.xlu0 %v666_v22, %s1254_s1 }
  0xf2   :  { %730 = vrot.lane.b32.xlu1 %v682_v17, %s1252_s11  ;;  %v327_v28 = vpop.permute.xlu0 %326 }
  0xf4   :  { %v455_v30 = vpop.permute.xlu1 %454  ;;  %714 = vrot.lane.b32.xlu0 %v666_v22, %s1252_s11 }
  0xf5   :  { %v652_v39 = vsel %vm624_vm1, %v359_v26, %v455_v30 }
  0xf6   :  { %v423_v31 = vpop.permute.xlu0 %422 }
  0xf7   :  { %v636_v35 = vsel %vm624_vm1, %v327_v28, %v423_v31 }
  0xf8   :  { %v549_v1 = vpop.permute.xlu1 %548 }
  0xf9   :  { %v668_v3 = vsel %vm657_vm0, %v635_v33, %v549_v1 }
  0xfa   :  { %716 = vrot.lane.b32.xlu0 %v668_v3, %s1252_s11  ;;  %v547_v21 = vpop.permute.xlu0 %546 }
  0xfb   :  { %v1710_v23 = vsel %vm657_vm0, %v634_v34, %v547_v21 }
  0xfc   :  { %v581_v63 = vpop.permute.xlu1 %580 }
  0xfd   :  { %v684_v8 = vsel %vm657_vm0, %v651_v62, %v581_v63 }
  0xfe   :  { %732 = vrot.lane.b32.xlu1 %v684_v8, %s1252_s11  ;;  %778 = vrot.lane.b32.xlu0 %v1710_v23, %s1253_s18  ;;  %v579_v16 = vpop.permute.xlu0 %578 }
  0xff   :  { %v1718_v38 = vsel %vm657_vm0, %v650_v36, %v579_v16 }
 0x100   :  { %v361_v37 = vpop.permute.xlu1 %360 }
 0x102   :  { %794 = vrot.lane.b32.xlu1 %v1718_v38, %s1253_s18  ;;  %v329_v11 = vpop.permute.xlu0 %328 }
 0x104   :  { %v457_v32 = vpop.permute.xlu1 %456 }
 0x105   :  { %v653_v42 = vsel %vm624_vm1, %v361_v37, %v457_v32 }
 0x106   :  { %v425_v9 = vpop.permute.xlu0 %424 }
 0x107   :  { %v637_v49 = vsel %vm624_vm1, %v329_v11, %v425_v9 }
 0x108   :  { %v583_v40 = vpop.permute.xlu1 %582 }
 0x109   :  { %v1724_v13 = vsel %vm657_vm0, %v652_v39, %v583_v40 }
 0x10a   :  { %796 = vrot.lane.b32.xlu1 %v1724_v13, %s1253_s18  ;;  %v551_v27 = vpop.permute.xlu0 %550 }
 0x10b   :  { %v1730_v41 = vsel %vm657_vm0, %v636_v35, %v551_v27 }
 0x10c   :  { %v585_v25 = vpop.permute.xlu1 %584  ;;  %780 = vrot.lane.b32.xlu0 %v1730_v41, %s1253_s18 }
 0x10d   :  { %v686_v48 = vsel %vm657_vm0, %v653_v42, %v585_v25 }
 0x10e   :  { %843 = vrot.lane.b32.xlu1 %v684_v8, %s1254_s1  ;;  %v553_v29 = vpop.permute.xlu0 %552  ;;  %v1255_v8 = vmov 0.0  }
 0x10f   :  { %v670_v43 = vsel %vm657_vm0, %v637_v49, %v553_v29 }
 0x110   :  { %v333_v44 = vpop.permute.xlu1 %332  ;;  %827 = vrot.lane.b32.xlu0 %v668_v3, %s1254_s1 }
 0x112   :  { %845 = vrot.lane.b32.xlu1 %v686_v48, %s1254_s1  ;;  %v331_v50 = vpop.permute.xlu0 %330 }
 0x114   :  { %v365_v46 = vpop.permute.xlu1 %364  ;;  %829 = vrot.lane.b32.xlu0 %v670_v43, %s1254_s1 }
 0x116   :  { %734 = vrot.lane.b32.xlu1 %v686_v48, %s1252_s11  ;;  %v363_v51 = vpop.permute.xlu0 %362 }
 0x118   :  { %v429_v45 = vpop.permute.xlu1 %428  ;;  %718 = vrot.lane.b32.xlu0 %v670_v43, %s1252_s11 }
 0x119   :  { %v639_v61 = vsel %vm624_vm1, %v333_v44, %v429_v45 }
 0x11a   :  { %v427_v47 = vpop.permute.xlu0 %426 }
 0x11b   :  { %v638_v10 = vsel %vm624_vm1, %v331_v50, %v427_v47 }
 0x11c   :  { %v461_v52 = vpop.permute.xlu1 %460 }
 0x11d   :  { %v655_v12 = vsel %vm624_vm1, %v365_v46, %v461_v52 }
 0x11e   :  { %v459_v53 = vpop.permute.xlu0 %458 }
 0x11f   :  { %v654_v20 = vsel %vm624_vm1, %v363_v51, %v459_v53 }
 0x120   :  { %v367_v54 = vpop.permute.xlu1 %366 }
 0x122   :  { %v335_v55 = vpop.permute.xlu0 %334 }
 0x124   :  { %v463_v59 = vpop.permute.xlu1 %462 }
 0x125   :  { %v656_v33 = vsel %vm624_vm1, %v367_v54, %v463_v59 }
 0x126   :  { %v431_v56 = vpop.permute.xlu0 %430 }
 0x127   :  { %v640_v28 = vsel %vm624_vm1, %v335_v55, %v431_v56 }
 0x128   :  { %v557_v0 = vpop.permute.xlu1 %556 }
 0x129   :  { %v672_v57 = vsel %vm657_vm0, %v639_v61, %v557_v0 }
 0x12a   :  { %720 = vrot.lane.b32.xlu0 %v672_v57, %s1252_s11  ;;  %v555_v4 = vpop.permute.xlu0 %554 }
 0x12b   :  { %v1750_v15 = vsel %vm657_vm0, %v638_v10, %v555_v4 }
 0x12c   :  { %v589_v14 = vpop.permute.xlu1 %588 }
 0x12d   :  { %v688_v17 = vsel %vm657_vm0, %v655_v12, %v589_v14 }
 0x12e   :  { %736 = vrot.lane.b32.xlu1 %v688_v17, %s1252_s11  ;;  %782 = vrot.lane.b32.xlu0 %v1750_v15, %s1253_s18  ;;  %v587_v18 = vpop.permute.xlu0 %586 }
 0x12f   :  { %v1758_v26 = vsel %vm657_vm0, %v654_v20, %v587_v18 }
 0x130   :  { %v591_v22 = vpop.permute.xlu1 %590 }
 0x131   :  { %v689_v3 = vsel %vm657_vm0, %v656_v33, %v591_v22 }
 0x132   :  { %798 = vrot.lane.b32.xlu1 %v1758_v26, %s1253_s18  ;;  %v559_v30 = vpop.permute.xlu0 %558 }
 0x133   :  { %v673_v31 = vsel %vm657_vm0, %v640_v28, %v559_v30 }
 0x134   :  { %v723_v1 = vpop.permute.xlu1 %722  ;;  %784 = vrot.lane.b32.xlu0 %v673_v31, %s1253_s18 }
 0x135   :  { %v873_v11 = vsel %vm864_vm2, 0.0, %v723_v1 }
 0x136   :  { %800 = vrot.lane.b32.xlu1 %v689_v3, %s1253_s18  ;;  %v707_v21 = vpop.permute.xlu0 %706 }
 0x137   :  { %v865_v39 = vsel %vm864_vm2, 0.0, %v707_v21 }
 0x138   :  { %v725_v34 = vpop.permute.xlu1 %724  ;;  %831 = vrot.lane.b32.xlu0 %v672_v57, %s1254_s1 }
 0x139   :  { %v874_v25 = vsel %vm864_vm2, %v1602_v5, %v725_v34 }
 0x13a   :  { %847 = vrot.lane.b32.xlu1 %v688_v17, %s1254_s1  ;;  %v709_v62 = vpop.permute.xlu0 %708 }
 0x13b   :  { %v866_v48 = vsel %vm864_vm2, %v1614_v19, %v709_v62 }
 0x13c   :  { %v787_v63 = vpop.permute.xlu1 %786  ;;  %833 = vrot.lane.b32.xlu0 %v1255_v8, %s1254_s1 }
 0x13d   :  { %v890_v32 = vsel %vm881_vm3, %v873_v11, %v787_v63 }
 0x13e   :  { %v771_v16 = vpop.permute.xlu0 %770 }
 0x13f   :  { %v882_v35 = vsel %vm881_vm3, %v865_v39, %v771_v16 }
 0x140   :  { %v789_v36 = vpop.permute.xlu1 %788 }
 0x141   :  { %v891_v42 = vsel %vm881_vm3, %v874_v25, %v789_v36 }
 0x142   :  { %v773_v37 = vpop.permute.xlu0 %772 }
 0x143   :  { %v883_v50 = vsel %vm881_vm3, %v866_v48, %v773_v37 }
 0x144   :  { %v836_v9 = vpop.permute.xlu1 %835 }
 0x145   :  { %v907_v40 = vsel %vm898_vm4, %v890_v32, %v836_v9 }
 0x146   :  { %1214 = vmatprep.mubr.msk.f32.mxu1 %vm930_vm5, %v907_v40  ;;  %v820_v27 = vpop.permute.xlu0 %819 }
 0x147   :  { %v899_v29 = vsel %vm898_vm4, %v882_v35, %v820_v27 }
 0x148   :  { %v838_v44 = vpop.permute.xlu1 %837  ;;  %1202 = vmatprep.mubr.msk.f32.mxu0 %vm930_vm5, %v899_v29 }
 0x149   :  { %v908_v49 = vsel %vm898_vm4, %v891_v42, %v838_v44 }
 0x14a   :  { %1215 = vmatmul.mubr.msk.f32.vlgmr.msra.gmra.mxu1 %vm930_vm5, %v908_v49  ;;  %v822_v43 = vpop.permute.xlu0 %821 }
 0x14b   :  { %v900_v46 = vsel %vm898_vm4, %v883_v50, %v822_v43 }
 0x14c   :  { %v727_v5 = vpop.permute.xlu1 %726  ;;  %1203 = vmatmul.mubr.msk.f32.vlgmr.msra.gmra.mxu0 %vm930_vm5, %v900_v46 }
 0x14d   :  { %v875_v19 = vsel %vm864_vm2, %v1623_v7, %v727_v5 }
 0x14e   :  { %v711_v51 = vpop.permute.xlu0 %710 }
 0x14f   :  { %v867_v61 = vsel %vm864_vm2, %v1632_v24, %v711_v51 }
 0x150   :  { %v729_v45 = vpop.permute.xlu1 %728 }
 0x151   :  { %v876_v10 = vsel %vm864_vm2, %v1666_v58, %v729_v45 }
 0x152   :  { %v713_v47 = vpop.permute.xlu0 %712 }
 0x153   :  { %v868_v24 = vsel %vm864_vm2, %v1674_v60, %v713_v47 }
 0x154   :  { %v791_v52 = vpop.permute.xlu1 %790 }
 0x155   :  { %v892_v59 = vsel %vm881_vm3, %v875_v19, %v791_v52 }
 0x156   :  { %v775_v53 = vpop.permute.xlu0 %774 }
 0x157   :  { %v884_v57 = vsel %vm881_vm3, %v867_v61, %v775_v53 }
 0x158   :  { %v793_v54 = vpop.permute.xlu1 %792 }
 0x159   :  { %v893_v7 = vsel %vm881_vm3, %v876_v10, %v793_v54 }
 0x15a   :  { %v777_v55 = vpop.permute.xlu0 %776 }
 0x15b   :  { %v885_v18 = vsel %vm881_vm3, %v868_v24, %v777_v55 }
 0x15c   :  { %v840_v56 = vpop.permute.xlu1 %839 }
 0x15d   :  { %v909_v0 = vsel %vm898_vm4, %v892_v59, %v840_v56 }
 0x15e   :  { %1217 = vmatprep.mubr.msk.f32.mxu1 %vm930_vm5, %v909_v0  ;;  %v824_v4 = vpop.permute.xlu0 %823 }
 0x15f   :  { %v901_v12 = vsel %vm898_vm4, %v884_v57, %v824_v4 }
 0x160   :  { %v842_v14 = vpop.permute.xlu1 %841  ;;  %1205 = vmatprep.mubr.msk.f32.mxu0 %vm930_vm5, %v901_v12 }
 0x161   :  { %v910_v17 = vsel %vm898_vm4, %v893_v7, %v842_v14 }
 0x162   :  { %1218 = vmatmul.mubr.msk.f32.gmra.mxu1 %vm930_vm5, %v910_v17  ;;  %v826_v20 = vpop.permute.xlu0 %825 }
 0x163   :  { %v902_v22 = vsel %vm898_vm4, %v885_v18, %v826_v20 }
 0x164   :  { %1206 = vmatmul.mubr.msk.f32.gmra.mxu0 %vm930_vm5, %v902_v22  ;;  %v731_v58 = vpop.permute.xlu1 %730 }
 0x165   :  { %v877_v60 = vsel %vm864_vm2, %v1682_v2, %v731_v58 }
 0x166   :  { %v715_v28 = vpop.permute.xlu0 %714 }
 0x167   :  { %v869_v63 = vsel %vm864_vm2, %v1690_v6, %v715_v28 }
 0x16c   :  { %v717_v31 = vpop.permute.xlu0 %716 }
 0x16d   :  { %v870_v6 = vsel %vm864_vm2, %v1710_v23, %v717_v31 }
 0x170   :  { %v733_v30 = vpop.permute.xlu1 %732  ;;  %v779_v1 = vpop.permute.xlu0 %778 }
 0x171   :  { %v886_v16 = vsel %vm881_vm3, %v869_v63, %v779_v1  ;;  %v878_v37 = vsel %vm864_vm2, %v1718_v38, %v733_v30 }
 0x174   :  { %v795_v33 = vpop.permute.xlu1 %794 }
 0x175   :  { %v894_v34 = vsel %vm881_vm3, %v877_v60, %v795_v33 }
 0x17c   :  { %v797_v3 = vpop.permute.xlu1 %796 }
 0x17d   :  { %v895_v2 = vsel %vm881_vm3, %v878_v37, %v797_v3 }
 0x17e   :  { %v781_v21 = vpop.permute.xlu0 %780 }
 0x17f   :  { %v887_v39 = vsel %vm881_vm3, %v870_v6, %v781_v21 }
 0x180   :  { %v844_v62 = vpop.permute.xlu1 %843 }
 0x181   :  { %v911_v8 = vsel %vm898_vm4, %v894_v34, %v844_v62 }
 0x182   :  { %1220 = vmatprep.mubr.msk.f32.mxu1 %vm930_vm5, %v911_v8  ;;  %v828_v36 = vpop.permute.xlu0 %827 }
 0x183   :  { %v903_v11 = vsel %vm898_vm4, %v886_v16, %v828_v36 }
 0x184   :  { %v846_v32 = vpop.permute.xlu1 %845  ;;  %1208 = vmatprep.mubr.msk.f32.mxu0 %vm930_vm5, %v903_v11 }
 0x185   :  { %v912_v9 = vsel %vm898_vm4, %v895_v2, %v846_v32 }
 0x186   :  { %1221 = vmatmul.mubr.msk.f32.gmra.mxu1 %vm930_vm5, %v912_v9  ;;  %v830_v40 = vpop.permute.xlu0 %829 }
 0x187   :  { %v904_v35 = vsel %vm898_vm4, %v887_v39, %v830_v40 }
 0x188   :  { %1209 = vmatmul.mubr.msk.f32.gmra.mxu0 %vm930_vm5, %v904_v35  ;;  %v735_v27 = vpop.permute.xlu1 %734 }
 0x189   :  { %v879_v46 = vsel %vm864_vm2, %v1724_v13, %v735_v27 }
 0x18a   :  { %v719_v38 = vpop.permute.xlu0 %718 }
 0x18b   :  { %v871_v23 = vsel %vm864_vm2, %v1730_v41, %v719_v38 }
 0x19c   :  { %v721_v25 = vpop.permute.xlu0 %720 }
 0x19d   :  { %v872_v47 = vsel %vm864_vm2, %v1750_v15, %v721_v25  ;;  %v1145_v15 = vld [vmem:[%s1918_s2] ss:$0 sm:$0xff] }
 0x1a0   :  { %v737_v29 = vpop.permute.xlu1 %736  ;;  %v783_v42 = vpop.permute.xlu0 %782 }
 0x1a1   :  { %v888_v50 = vsel %vm881_vm3, %v871_v23, %v783_v42  ;;  %v880_v52 = vsel %vm864_vm2, %v1758_v26, %v737_v29 }
 0x1a4   :  { %v799_v44 = vpop.permute.xlu1 %798 }
 0x1a5   :  { %v896_v51 = vsel %vm881_vm3, %v879_v46, %v799_v44 }
 0x1a6   :  { %v785_v48 = vpop.permute.xlu0 %784 }
 0x1a7   :  { %v889_v53 = vsel %vm881_vm3, %v872_v47, %v785_v48 }
 0x1a8   :  { %v801_v49 = vpop.permute.xlu1 %800 }
 0x1a9   :  { %v897_v54 = vsel %vm881_vm3, %v880_v52, %v801_v49 }
 0x1aa   :  { %v832_v43 = vpop.permute.xlu0 %831 }
 0x1ab   :  { %v905_v5 = vsel %vm898_vm4, %v888_v50, %v832_v43 }
 0x1ac   :  { %v848_v45 = vpop.permute.xlu1 %847  ;;  %1211 = vmatprep.mubr.msk.f32.mxu0 %vm930_vm5, %v905_v5 }
 0x1ad   :  { %v913_v41 = vsel %vm898_vm4, %v896_v51, %v848_v45 }
 0x1ae   :  { %1223 = vmatprep.mubr.msk.f32.mxu1 %vm930_vm5, %v913_v41  ;;  %v834_v13 = vpop.permute.xlu0 %833 }
 0x1af   :  { %v906_v55 = vsel %vm898_vm4, %v889_v53, %v834_v13  ;;  %v914_v19 = vsel %vm898_vm4, %v897_v54, %v834_v13 }
 0x1b0   :  { %1212 = vmatmul.mubr.msk.f32.gmra.mxu0 %vm930_vm5, %v906_v55  ;;  %1224 = vmatmul.mubr.msk.f32.gmra.mxu1 %vm930_vm5, %v914_v19 }
 0x20a   :  { %v1216_v26 = vpop.f32.mrf.mxu1 }
 0x20b   :  { %v1091_v59 = vadd.f32 %v1216_v26, %v1145_v15 }
 0x20c   :  { %v1204_v56 = vpop.f32.mrf.mxu0  ;;  %v1085_v61 = vpop.f32.mrf.mxu1 }
 0x20d   :  { %1134 = vst.msk [vmem:[%s1919_s3 + $0x48] sm:$0xff] %vm1124_vm6, %v1091_v59  ;;  %v1051_v0 = vadd.f32 %v1204_v56, %v1145_v15  ;;  %v1086_v57 = vadd.f32 %v1145_v15, %v1085_v61 }
 0x20e   :  { %v1045_v4 = vpop.f32.mrf.mxu0 }
 0x20f   :  { %1126 = vst.msk [vmem:[%s1919_s3 + $0x8] sm:$0xff] %vm1124_vm6, %v1051_v0  ;;  %1133 = vst.msk [vmem:[%s1919_s3 + $0x40] sm:$0xff] %vm1124_vm6, %v1086_v57  ;;  %v1046_v10 = vadd.f32 %v1145_v15, %v1045_v4 }
 0x211   :  { %1125 = vst.msk [vmem:[%s1919_s3] sm:$0xff] %vm1124_vm6, %v1046_v10 }
 0x222   :  { %v1219_v12 = vpop.f32.mrf.mxu1 }
 0x223   :  { %v1101_v7 = vadd.f32 %v1219_v12, %v1145_v15 }
 0x224   :  { %v1207_v14 = vpop.f32.mrf.mxu0  ;;  %v1095_v24 = vpop.f32.mrf.mxu1 }
 0x225   :  { %1136 = vst.msk [vmem:[%s1919_s3 + $0x58] sm:$0xff] %vm1124_vm6, %v1101_v7  ;;  %v1061_v17 = vadd.f32 %v1207_v14, %v1145_v15  ;;  %v1096_v18 = vadd.f32 %v1145_v15, %v1095_v24 }
 0x226   :  { %v1055_v20 = vpop.f32.mrf.mxu0 }
 0x227   :  { %1128 = vst.msk [vmem:[%s1919_s3 + $0x18] sm:$0xff] %vm1124_vm6, %v1061_v17  ;;  %1135 = vst.msk [vmem:[%s1919_s3 + $0x50] sm:$0xff] %vm1124_vm6, %v1096_v18  ;;  %v1056_v22 = vadd.f32 %v1145_v15, %v1055_v20 }
 0x229   :  { %1127 = vst.msk [vmem:[%s1919_s3 + $0x10] sm:$0xff] %vm1124_vm6, %v1056_v22 }
 0x246   :  { %v1222_v58 = vpop.f32.mrf.mxu1 }
 0x247   :  { %v1111_v28 = vadd.f32 %v1222_v58, %v1145_v15 }
 0x248   :  { %v1210_v30 = vpop.f32.mrf.mxu0  ;;  %v1105_v31 = vpop.f32.mrf.mxu1 }
 0x249   :  { %1138 = vst.msk [vmem:[%s1919_s3 + $0x68] sm:$0xff] %vm1124_vm6, %v1111_v28  ;;  %v1071_v33 = vadd.f32 %v1210_v30, %v1145_v15  ;;  %v1106_v1 = vadd.f32 %v1145_v15, %v1105_v31 }
 0x24a   :  { %v1065_v3 = vpop.f32.mrf.mxu0 }
 0x24b   :  { %1130 = vst.msk [vmem:[%s1919_s3 + $0x28] sm:$0xff] %vm1124_vm6, %v1071_v33  ;;  %1137 = vst.msk [vmem:[%s1919_s3 + $0x60] sm:$0xff] %vm1124_vm6, %v1106_v1  ;;  %v1066_v21 = vadd.f32 %v1145_v15, %v1065_v3 }
 0x24d   :  { %1129 = vst.msk [vmem:[%s1919_s3 + $0x20] sm:$0xff] %vm1124_vm6, %v1066_v21 }
 0x270   :  { %v1213_v60 = vpop.f32.mrf.mxu0  ;;  %v1225_v34 = vpop.f32.mrf.mxu1 }
 0x271   :  { %v1081_v62 = vadd.f32 %v1213_v60, %v1145_v15  ;;  %v1121_v63 = vadd.f32 %v1225_v34, %v1145_v15 }
 0x272   :  { %v1075_v8 = vpop.f32.mrf.mxu0  ;;  %v1115_v16 = vpop.f32.mrf.mxu1 }
 0x273   :  { %1132 = vst.msk [vmem:[%s1919_s3 + $0x38] sm:$0xff] %vm1124_vm6, %v1081_v62  ;;  %1140 = vst.msk [vmem:[%s1919_s3 + $0x78] sm:$0xff] %vm1124_vm6, %v1121_v63  ;;  %v1076_v36 = vadd.f32 %v1145_v15, %v1075_v8  ;;  %v1116_v37 = vadd.f32 %v1145_v15, %v1115_v16 }
 0x275   :  { %1131 = vst.msk [vmem:[%s1919_s3 + $0x30] sm:$0xff] %vm1124_vm6, %v1076_v36  ;;  %1139 = vst.msk [vmem:[%s1919_s3 + $0x70] sm:$0xff] %vm1124_vm6, %v1116_v37 }

</bundles_post_ra>
